<compile_context>
chip_gen: v5e
topology: v5e:2x2
jax: 0.10.0
libtpu: 0.0.40
codegen_flags: <defaults>
</compile_context>

<pallas_src>
import jax
import jax.numpy as jnp
from jax.experimental import pallas as pl
from jax.experimental.pallas import tpu as pltpu


def autoencoder_kernel(x_ref, w12_ref, b12_ref, w34_ref, b34_ref, o_ref):
    x = x_ref[...]

    # encoder (fused Linear.Linear) + ReLU
    h = jnp.dot(x, w12_ref[...], preferred_element_type=jnp.float32) + b12_ref[...]
    h = jnp.maximum(h, 0.0)

    # decoder (fused Linear.Linear)
    out = jnp.dot(h, w34_ref[...], preferred_element_type=jnp.float32) + b34_ref[...]

    o_ref[...] = out.astype(o_ref.dtype)


def autoencoder_forward(x, fused, *, tb_cap=2048):
    """x: (B, input_dim) float32. fused: dict with w12, b12, w34, b34."""
    B, D_in = x.shape
    w12, b12 = fused["w12"], fused["b12"]
    w34, b34 = fused["w34"], fused["b34"]
    mid = w12.shape[1]

    # Tile selection:
    #  * B <= tb_cap: one grid step, block == full batch dim (legal for any B,
    #    even if not a multiple of 8; avoids per-step overhead entirely).
    #  * B  > tb_cap: 8-aligned tile of tb_cap rows; the partial last block (if
    #    any) is masked by Pallas -- no host-side padding copy needed.
    if B <= tb_cap:
        tb = B
    else:
        tb = tb_cap  # multiple of 8 by construction (tb_cap=2048)

    grid = (pl.cdiv(B, tb),)

    # Advisory cost hint for XLA scheduling (f32 bytes).
    flops = 2 * B * (D_in * mid + mid * D_in)
    bytes_accessed = 4 * (2 * B * D_in + w12.size + b12.size + w34.size + b34.size)

    out = pl.pallas_call(
        autoencoder_kernel,
        out_shape=jax.ShapeDtypeStruct((B, D_in), x.dtype),
        grid=grid,
        in_specs=[
            pl.BlockSpec((tb, D_in), lambda i: (i, 0)),   # x tile (pipelined per step)
            # Constant-index blocks: DMA'd once, VMEM-resident across the grid.
            pl.BlockSpec(w12.shape, lambda i: (0, 0)),
            pl.BlockSpec(b12.shape, lambda i: (0, 0)),
            pl.BlockSpec(w34.shape, lambda i: (0, 0)),
            pl.BlockSpec(b34.shape, lambda i: (0, 0)),
        ],
        out_specs=pl.BlockSpec((tb, D_in), lambda i: (i, 0)),
        compiler_params=pltpu.CompilerParams(
            dimension_semantics=("parallel",),  # batch axis shards across TCs on v7x
        ),
        cost_estimate=pl.CostEstimate(
            flops=flops, transcendentals=0, bytes_accessed=bytes_accessed),
    )(x, w12, b12, w34, b34)

    return out


def init_params(key, input_dim, encoding_dim):
    """Deterministic init matching nn.Linear's default U(-1/sqrt(fan_in), ...).

    Weights stored transposed vs PyTorch: (in_features, out_features).
    """
    dims = [
        (input_dim, encoding_dim),          # encoder layer 1
        (encoding_dim, encoding_dim // 2),  # encoder layer 2
        (encoding_dim // 2, encoding_dim),  # decoder layer 1
        (encoding_dim, input_dim),          # decoder layer 2
    ]
    params = {}
    keys = jax.random.split(key, 2 * len(dims))
    for i, (fan_in, fan_out) in enumerate(dims):
        bound = 1.0 / (fan_in ** 0.5)
        w = jax.random.uniform(keys[2 * i], (fan_in, fan_out),
                               minval=-bound, maxval=bound, dtype=jnp.float32)
        b = jax.random.uniform(keys[2 * i + 1], (1, fan_out),
                               minval=-bound, maxval=bound, dtype=jnp.float32)
        params[f"w{i + 1}"] = w
        params[f"b{i + 1}"] = b
    return params


def fuse_params(p):
    """Fold the two encoder linears and the two decoder linears (no nonlinearity
    between them) into single affine maps. Done once, outside the hot path."""
    w12 = p["w1"] @ p["w2"]
    b12 = p["b1"] @ p["w2"] + p["b2"]
    w34 = p["w3"] @ p["w4"]
    b34 = p["b3"] @ p["w4"] + p["b4"]
    return {"w12": w12, "b12": b12, "w34": w34, "b34": b34}


def reference_forward(x, p):
    """Unfused reference matching the PyTorch module layer-by-layer."""
    h = x @ p["w1"] + p["b1"]
    h = h @ p["w2"] + p["b2"]
    h = jnp.maximum(h, 0.0)
    h = h @ p["w3"] + p["b3"]
    return h @ p["w4"] + p["b4"]


if __name__ == "__main__":
    input_dim = 128
    encoding_dim = 64
    batch = 256          # <= tb_cap -> single grid step, no per-step overhead

    key = jax.random.PRNGKey(0)
    k_x, k_p = jax.random.split(key)
    x = jax.random.normal(k_x, (batch, input_dim), dtype=jnp.float32)
    params = init_params(k_p, input_dim, encoding_dim)
    fused = fuse_params(params)

    out = autoencoder_forward(x, fused)
    out = jax.block_until_ready(out)

    ref = reference_forward(x, params)
    assert out.shape == (batch, input_dim)
    assert jnp.allclose(out, ref, atol=1e-4, rtol=1e-4), "mismatch vs reference"

    print("KERNEL_OK")
</pallas_src>

<mosaic_0001>
module attributes {stable_mosaic.version = 11 : i64} {
  func.func @autoencoder_kernel(%arg0: i32, %arg1: memref<256x128xf32, #tpu.memory_space<vmem>>, %arg2: memref<128x32xf32, #tpu.memory_space<vmem>>, %arg3: memref<1x32xf32, #tpu.memory_space<vmem>>, %arg4: memref<32x128xf32, #tpu.memory_space<vmem>>, %arg5: memref<1x128xf32, #tpu.memory_space<vmem>>, %arg6: memref<256x128xf32, #tpu.memory_space<vmem>>) attributes {dimension_semantics = [#tpu.dimension_semantics<parallel>], iteration_bounds = array<i64: 1>, scalar_prefetch = 0 : i64, scratch_operands = 0 : i64, tpu.core_type = #tpu.core_type<tc>, window_params = [{transform_indices = @transform_0, window_bounds = array<i64: 256, 128>}, {pipeline_mode = #tpu.pipeline_mode<synchronous>, transform_indices = @transform_1, window_bounds = array<i64: 128, 32>}, {pipeline_mode = #tpu.pipeline_mode<synchronous>, transform_indices = @transform_2, window_bounds = array<i64: 1, 32>}, {pipeline_mode = #tpu.pipeline_mode<synchronous>, transform_indices = @transform_3, window_bounds = array<i64: 32, 128>}, {pipeline_mode = #tpu.pipeline_mode<synchronous>, transform_indices = @transform_4, window_bounds = array<i64: 1, 128>}, {transform_indices = @transform_5, window_bounds = array<i64: 256, 128>}]} {
    %c0 = arith.constant 0 : index
    %c0_0 = arith.constant 0 : index
    %0 = vector.load %arg1[%c0, %c0_0] : memref<256x128xf32, #tpu.memory_space<vmem>>, vector<256x128xf32>
    %c0_1 = arith.constant 0 : index
    %c0_2 = arith.constant 0 : index
    %1 = vector.load %arg2[%c0_1, %c0_2] : memref<128x32xf32, #tpu.memory_space<vmem>>, vector<128x32xf32>
    %cst = arith.constant dense<0.000000e+00> : vector<256x32xf32>
    %2 = tpu.matmul %0, %1, %cst {dimension_numbers = #tpu.dot_dimension_numbers<[1], [0], [0], [1], [0, 0, 1, 1], [], []>} : vector<256x128xf32>, vector<128x32xf32>, vector<256x32xf32> -> vector<256x32xf32>
    %c0_3 = arith.constant 0 : index
    %c0_4 = arith.constant 0 : index
    %3 = vector.load %arg3[%c0_3, %c0_4] : memref<1x32xf32, #tpu.memory_space<vmem>>, vector<1x32xf32>
    %4 = vector.broadcast %3 : vector<1x32xf32> to vector<256x32xf32>
    %5 = arith.addf %2, %4 : vector<256x32xf32>
    %cst_5 = arith.constant 0.000000e+00 : f32
    %6 = vector.broadcast %cst_5 : f32 to vector<256x32xf32>
    %7 = arith.maximumf %5, %6 : vector<256x32xf32>
    %c0_6 = arith.constant 0 : index
    %c0_7 = arith.constant 0 : index
    %8 = vector.load %arg4[%c0_6, %c0_7] : memref<32x128xf32, #tpu.memory_space<vmem>>, vector<32x128xf32>
    %cst_8 = arith.constant dense<0.000000e+00> : vector<256x128xf32>
    %9 = tpu.matmul %7, %8, %cst_8 {dimension_numbers = #tpu.dot_dimension_numbers<[1], [0], [0], [1], [0, 0, 1, 1], [], []>} : vector<256x32xf32>, vector<32x128xf32>, vector<256x128xf32> -> vector<256x128xf32>
    %c0_9 = arith.constant 0 : index
    %c0_10 = arith.constant 0 : index
    %10 = vector.load %arg5[%c0_9, %c0_10] : memref<1x128xf32, #tpu.memory_space<vmem>>, vector<1x128xf32>
    %11 = vector.broadcast %10 : vector<1x128xf32> to vector<256x128xf32>
    %12 = arith.addf %9, %11 : vector<256x128xf32>
    %c0_11 = arith.constant 0 : index
    %c0_12 = arith.constant 0 : index
    %13 = vector.load %arg6[%c0_11, %c0_12] : memref<256x128xf32, #tpu.memory_space<vmem>>, vector<256x128xf32>
    tpu.vector_store %arg6[%c0_11, %c0_12], %12 {strides = array<i32>} : memref<256x128xf32, #tpu.memory_space<vmem>>, vector<256x128xf32>,
    return
  }
  func.func @transform_0(%arg0: i32) -> (i32, i32) {
    %c0_i32 = arith.constant 0 : i32
    %c0_i32_0 = arith.constant 0 : i32
    return %arg0, %c0_i32 : i32, i32
  }
  func.func @transform_1(%arg0: i32) -> (i32, i32) {
    %c0_i32 = arith.constant 0 : i32
    %c0_i32_0 = arith.constant 0 : i32
    %c0_i32_1 = arith.constant 0 : i32
    return %c0_i32, %c0_i32_0 : i32, i32
  }
  func.func @transform_2(%arg0: i32) -> (i32, i32) {
    %c0_i32 = arith.constant 0 : i32
    %c0_i32_0 = arith.constant 0 : i32
    %c0_i32_1 = arith.constant 0 : i32
    return %c0_i32, %c0_i32_0 : i32, i32
  }
  func.func @transform_3(%arg0: i32) -> (i32, i32) {
    %c0_i32 = arith.constant 0 : i32
    %c0_i32_0 = arith.constant 0 : i32
    %c0_i32_1 = arith.constant 0 : i32
    return %c0_i32, %c0_i32_0 : i32, i32
  }
  func.func @transform_4(%arg0: i32) -> (i32, i32) {
    %c0_i32 = arith.constant 0 : i32
    %c0_i32_0 = arith.constant 0 : i32
    %c0_i32_1 = arith.constant 0 : i32
    return %c0_i32, %c0_i32_0 : i32, i32
  }
  func.func @transform_5(%arg0: i32) -> (i32, i32) {
    %c0_i32 = arith.constant 0 : i32
    %c0_i32_0 = arith.constant 0 : i32
    return %arg0, %c0_i32 : i32, i32
  }
}

</mosaic_0001>

<bundles_post_ra>
// kernel: tpu_custom_call.1
= control target key start
LH: loop header
LB: loop body
LE: loop exit
PB: predicated region body
PF: predicated region fallthrough
CT: control target
= control target key end

     0   :  { %10 = vsyncpa [#allocation3], 0  ;;  %s850_s0 = inlined_call_operand.hbm [shape: f32[256,128], index: 0, kind: input, shape index: {}]   ;;  %s851_s1 = inlined_call_operand.vmem [shape: f32[128,32], index: 1, kind: input, shape index: {}]   ;;  %s852_s2 = inlined_call_operand.vmem [shape: f32[1,32], index: 2, kind: input, shape index: {}]   ;;  %s853_s3 = inlined_call_operand.vmem [shape: f32[32,128], index: 3, kind: input, shape index: {}]   ;;  %s854_s4 = inlined_call_operand.vmem [shape: f32[1,128], index: 4, kind: input, shape index: {}]   ;;  %s855_s5 = inlined_call_operand.hbm [shape: f32[256,128], index: 5, kind: output, shape index: {}]  }
   0x1   :  { %11 = vsyncpa [#allocation4], 0  ;;  %s16_s20 = sshll.u32 %s850_s0, 4  ;;  %s629_s21 = smov [#allocation2]   ;;  %s17_s20 = int_to_ptr.hbm [resolvable:$true] %s16_s20 }
   0x2   :  { %s18_s22 = sshll.u32 %s629_s21, 4  ;;  %s630_s23 = smov 128   ;;  %s19_s22 = int_to_ptr.vmem [resolvable:$true] %s18_s22 }
   0x3   :  { %s631_s24 = smov 8  }
   0x4   :  { %24 = dma.hbm_to_vmem [thread:$0]  %s17_s20, 4096, %s19_s22, [#allocation3], %s630_s23, %s630_s23, %s631_s24  }
   0x5   :  { %625 = dma.done.wait [#allocation3], 4096  }
   0x6   :  { %626 = vsyncadd [#allocation3], 4294963200  ;;  %v84_v0 = vld [vmem:[%s851_s1 + $0x78] sm:$0xff]  ;;  %v83_v1 = vld [vmem:[%s851_s1 + $0x70] sm:$0xff]  ;;  %vm242_vm0 = vcmask 261120   ;;  %s490_s19 = sshll.u32 %s855_s5, 4  ;;  %s491_s19 = int_to_ptr.hbm [resolvable:$true] %s490_s19 }
   0x7   :  { %89 = vmatpush.msra.mxu0 %v84_v0  ;;  %535 = vmatpush.msra.mxu2 %v84_v0  ;;  %v82_v2 = vld [vmem:[%s851_s1 + $0x68] sm:$0xff]  ;;  %v81_v3 = vld [vmem:[%s851_s1 + $0x60] sm:$0xff]  ;;  %v80_v4 = vld [vmem:[%s851_s1 + $0x58] sm:$0xff] }
   0x8   :  { %536 = vmatpush.msra.mxu3 %v84_v0  ;;  %v79_v5 = vld [vmem:[%s851_s1 + $0x50] sm:$0xff]  ;;  %v78_v6 = vld [vmem:[%s851_s1 + $0x48] sm:$0xff]  ;;  %v77_v7 = vld [vmem:[%s851_s1 + $0x40] sm:$0xff] }
   0x9   :  { %90 = vmatpush.msra.mxu0 %v83_v1  ;;  %537 = vmatpush.msra.mxu2 %v83_v1  ;;  %v76_v8 = vld [vmem:[%s851_s1 + $0x38] sm:$0xff]  ;;  %v75_v9 = vld [vmem:[%s851_s1 + $0x30] sm:$0xff]  ;;  %v74_v10 = vld [vmem:[%s851_s1 + $0x28] sm:$0xff] }
   0xa   :  { %538 = vmatpush.msra.mxu3 %v83_v1  ;;  %v73_v11 = vld [vmem:[%s851_s1 + $0x20] sm:$0xff]  ;;  %v72_v12 = vld [vmem:[%s851_s1 + $0x18] sm:$0xff]  ;;  %v71_v13 = vld [vmem:[%s851_s1 + $0x10] sm:$0xff] }
   0xb   :  { %91 = vmatpush.msra.mxu0 %v82_v2  ;;  %539 = vmatpush.msra.mxu2 %v82_v2  ;;  %v70_v14 = vld [vmem:[%s851_s1 + $0x8] sm:$0xff]  ;;  %v69_v15 = vld [vmem:[%s851_s1] sm:$0xff]  ;;  %v52_v17 = vld [vmem:[#allocation2 + $0x78] sm:$0xff] }
   0xc   :  { %540 = vmatpush.msra.mxu3 %v82_v2  ;;  %v37_v16 = vld [vmem:[#allocation2] sm:$0xff]  ;;  %v38_v18 = vld [vmem:[#allocation2 + $0x8] sm:$0xff]  ;;  %v39_v20 = vld [vmem:[#allocation2 + $0x10] sm:$0xff] }
   0xd   :  { %92 = vmatpush.msra.mxu0 %v81_v3  ;;  %541 = vmatpush.msra.mxu2 %v81_v3  ;;  %v53_v19 = vld [vmem:[#allocation2 + $0x80] sm:$0xff]  ;;  %v54_v21 = vld [vmem:[#allocation2 + $0x88] sm:$0xff]  ;;  %v40_v22 = vld [vmem:[#allocation2 + $0x18] sm:$0xff] }
   0xe   :  { %542 = vmatpush.msra.mxu3 %v81_v3  ;;  %v55_v23 = vld [vmem:[#allocation2 + $0x90] sm:$0xff]  ;;  %v41_v24 = vld [vmem:[#allocation2 + $0x20] sm:$0xff]  ;;  %v56_v25 = vld [vmem:[#allocation2 + $0x98] sm:$0xff] }
   0xf   :  { %93 = vmatpush.msra.mxu0 %v80_v4  ;;  %543 = vmatpush.msra.mxu2 %v80_v4  ;;  %v42_v26 = vld [vmem:[#allocation2 + $0x28] sm:$0xff]  ;;  %v57_v27 = vld [vmem:[#allocation2 + $0xa0] sm:$0xff]  ;;  %v43_v28 = vld [vmem:[#allocation2 + $0x30] sm:$0xff] }
  0x10   :  { %544 = vmatpush.msra.mxu3 %v80_v4  ;;  %v58_v29 = vld [vmem:[#allocation2 + $0xa8] sm:$0xff]  ;;  %v44_v30 = vld [vmem:[#allocation2 + $0x38] sm:$0xff]  ;;  %v59_v31 = vld [vmem:[#allocation2 + $0xb0] sm:$0xff] }
  0x11   :  { %94 = vmatpush.msra.mxu0 %v79_v5  ;;  %545 = vmatpush.msra.mxu2 %v79_v5  ;;  %v45_v32 = vld [vmem:[#allocation2 + $0x40] sm:$0xff]  ;;  %v60_v33 = vld [vmem:[#allocation2 + $0xb8] sm:$0xff]  ;;  %v46_v34 = vld [vmem:[#allocation2 + $0x48] sm:$0xff] }
  0x12   :  { %546 = vmatpush.msra.mxu3 %v79_v5  ;;  %v61_v35 = vld [vmem:[#allocation2 + $0xc0] sm:$0xff]  ;;  %v47_v36 = vld [vmem:[#allocation2 + $0x50] sm:$0xff]  ;;  %v62_v37 = vld [vmem:[#allocation2 + $0xc8] sm:$0xff] }
  0x13   :  { %95 = vmatpush.msra.mxu0 %v78_v6  ;;  %547 = vmatpush.msra.mxu2 %v78_v6  ;;  %v48_v38 = vld [vmem:[#allocation2 + $0x58] sm:$0xff]  ;;  %v63_v39 = vld [vmem:[#allocation2 + $0xd0] sm:$0xff]  ;;  %v49_v42 = vld [vmem:[#allocation2 + $0x60] sm:$0xff] }
  0x14   :  { %548 = vmatpush.msra.mxu3 %v78_v6  ;;  %v237_v40 = vld [vmem:[%s853_s3 + $0x18] sm:$0xff]  ;;  %v236_v41 = vld [vmem:[%s853_s3 + $0x10] sm:$0xff]  ;;  %v235_v44 = vld [vmem:[%s853_s3 + $0x8] sm:$0xff] }
  0x15   :  { %96 = vmatpush.msra.mxu0 %v77_v7  ;;  %549 = vmatpush.msra.mxu2 %v77_v7  ;;  %v64_v43 = vld [vmem:[#allocation2 + $0xd8] sm:$0xff]  ;;  %v234_v46 = vld [vmem:[%s853_s3] sm:$0xff]  ;;  %v50_v47 = vld [vmem:[#allocation2 + $0x68] sm:$0xff] }
  0x16   :  { %550 = vmatpush.msra.mxu3 %v77_v7  ;;  %351 = vmatpush.msra.mxu1 %v237_v40  ;;  %v68_v45 = vld [vmem:[#allocation2 + $0xf8] sm:$0xff]  ;;  %v65_v48 = vld [vmem:[#allocation2 + $0xe0] sm:$0xff]  ;;  %v51_v49 = vld [vmem:[#allocation2 + $0x70] sm:$0xff] }
  0x17   :  { %97 = vmatpush.msra.mxu0 %v76_v8  ;;  %551 = vmatpush.msra.mxu2 %v76_v8  ;;  %v66_v50 = vld [vmem:[#allocation2 + $0xe8] sm:$0xff]  ;;  %v67_v51 = vld [vmem:[#allocation2 + $0xf0] sm:$0xff]  ;;  %v732_v52 = vld [vmem:[%s852_s2] ss:$0 sm:$0xff] }
  0x18   :  { %552 = vmatpush.msra.mxu3 %v76_v8  ;;  %352 = vmatpush.msra.mxu1 %v236_v41 }
  0x19   :  { %98 = vmatpush.msra.mxu0 %v75_v9  ;;  %553 = vmatpush.msra.mxu2 %v75_v9 }
  0x1a   :  { %554 = vmatpush.msra.mxu3 %v75_v9  ;;  %353 = vmatpush.msra.mxu1 %v235_v44 }
  0x1b   :  { %99 = vmatpush.msra.mxu0 %v74_v10  ;;  %555 = vmatpush.msra.mxu2 %v74_v10 }
  0x1c   :  { %556 = vmatpush.msra.mxu3 %v74_v10  ;;  %354 = vmatpush.msra.mxu1 %v234_v46 }
  0x1d   :  { %100 = vmatpush.msra.mxu0 %v73_v11  ;;  %557 = vmatpush.msra.mxu2 %v73_v11 }
  0x1e   :  { %558 = vmatpush.msra.mxu3 %v73_v11 }
  0x1f   :  { %101 = vmatpush.msra.mxu0 %v72_v12  ;;  %559 = vmatpush.msra.mxu2 %v72_v12 }
  0x20   :  { %560 = vmatpush.msra.mxu3 %v72_v12 }
  0x21   :  { %102 = vmatpush.msra.mxu0 %v71_v13  ;;  %561 = vmatpush.msra.mxu2 %v71_v13 }
  0x22   :  { %562 = vmatpush.msra.mxu3 %v71_v13 }
  0x23   :  { %103 = vmatpush.msra.mxu0 %v70_v14  ;;  %563 = vmatpush.msra.mxu2 %v70_v14 }
  0x24   :  { %564 = vmatpush.msra.mxu3 %v70_v14 }
  0x25   :  { %104 = vmatpush.msra.mxu0 %v69_v15  ;;  %565 = vmatpush.msra.mxu2 %v69_v15 }
  0x26   :  { %105 = vmatmul.f32.vlgmr.msra.gmra.mxu0 %v37_v16  ;;  %150 = vmatmul.f32.vlgmr.msra.gmra.mxu2 %v52_v17 }
  0x27   :  { %566 = vmatpush.msra.mxu3 %v69_v15 }
  0x28   :  { %198 = vmatmul.f32.vlgmr.msra.gmra.mxu3 %v68_v45 }
  0x29   :  { %567 = vmatpush.msrb.mxu3 %v237_v40 }
  0x2b   :  { %568 = vmatpush.msrb.mxu3 %v236_v41 }
  0x2d   :  { %569 = vmatpush.msrb.mxu3 %v235_v44 }
  0x2e   :  { %108 = vmatmul.f32.gmra.mxu0 %v38_v18  ;;  %153 = vmatmul.f32.gmra.mxu2 %v53_v19 }
  0x2f   :  { %570 = vmatpush.msrb.mxu3 %v234_v46 }
  0x36   :  { %111 = vmatmul.f32.gmra.mxu0 %v39_v20  ;;  %156 = vmatmul.f32.gmra.mxu2 %v54_v21 }
  0x3e   :  { %114 = vmatmul.f32.gmra.mxu0 %v40_v22  ;;  %159 = vmatmul.f32.gmra.mxu2 %v55_v23 }
  0x46   :  { %117 = vmatmul.f32.gmra.mxu0 %v41_v24  ;;  %162 = vmatmul.f32.gmra.mxu2 %v56_v25 }
  0x4e   :  { %120 = vmatmul.f32.gmra.mxu0 %v42_v26  ;;  %165 = vmatmul.f32.gmra.mxu2 %v57_v27 }
  0x56   :  { %123 = vmatmul.f32.gmra.mxu0 %v43_v28  ;;  %168 = vmatmul.f32.gmra.mxu2 %v58_v29 }
  0x5e   :  { %126 = vmatmul.f32.gmra.mxu0 %v44_v30  ;;  %171 = vmatmul.f32.gmra.mxu2 %v59_v31 }
  0x66   :  { %129 = vmatmul.f32.gmra.mxu0 %v45_v32  ;;  %174 = vmatmul.f32.gmra.mxu2 %v60_v33 }
  0x6e   :  { %132 = vmatmul.f32.gmra.mxu0 %v46_v34  ;;  %177 = vmatmul.f32.gmra.mxu2 %v61_v35 }
  0x76   :  { %135 = vmatmul.f32.gmra.mxu0 %v47_v36  ;;  %180 = vmatmul.f32.gmra.mxu2 %v62_v37 }
  0x7e   :  { %138 = vmatmul.f32.gmra.mxu0 %v48_v38  ;;  %183 = vmatmul.f32.gmra.mxu2 %v63_v39 }
  0x86   :  { %141 = vmatmul.f32.gmra.mxu0 %v49_v42  ;;  %186 = vmatmul.f32.gmra.mxu2 %v64_v43 }
  0x8e   :  { %144 = vmatmul.f32.gmra.mxu0 %v50_v47  ;;  %189 = vmatmul.f32.gmra.mxu2 %v65_v48 }
  0x96   :  { %147 = vmatmul.f32.gmra.mxu0 %v51_v49  ;;  %192 = vmatmul.f32.gmra.mxu2 %v66_v50 }
  0x9e   :  { %195 = vmatmul.f32.gmra.mxu2 %v67_v51 }
  0xa3   :  { %v106_v53 = vpop.f32.mrf.mxu0 }
  0xa4   :  { %v107_v54 = vadd.f32 %v732_v52, %v106_v53 }
  0xa6   :  { %v202_v55 = vmax.f32 %v107_v54, 0.0 }
  0xa8   :  { %503 = vmatmul.msk.f32.vlgmr.msra.gmra.mxu1 %vm242_vm0, %v202_v55 }
  0xa9   :  { %v736_v56 = vpop.f32.mrf.mxu2 }
  0xab   :  { %v109_v57 = vpop.f32.mrf.mxu0 }
  0xac   :  { %v110_v58 = vadd.f32 %v732_v52, %v109_v57 }
  0xae   :  { %v203_v59 = vmax.f32 %v110_v58, 0.0 }
  0xb0   :  { %504 = vmatmul.msk.f32.gmra.mxu1 %vm242_vm0, %v203_v59 }
  0xb1   :  { %v740_v60 = vpop.f32.mrf.mxu2 }
  0xb3   :  { %v112_v61 = vpop.f32.mrf.mxu0 }
  0xb4   :  { %v113_v62 = vadd.f32 %v732_v52, %v112_v61 }
  0xb6   :  { %v204_v63 = vmax.f32 %v113_v62, 0.0 }
  0xb8   :  { %505 = vmatmul.msk.f32.gmra.mxu1 %vm242_vm0, %v204_v63 }
  0xb9   :  { %v744_v0 = vpop.f32.mrf.mxu2 }
  0xbb   :  { %v115_v1 = vpop.f32.mrf.mxu0 }
  0xbc   :  { %v116_v2 = vadd.f32 %v732_v52, %v115_v1 }
  0xbe   :  { %v205_v3 = vmax.f32 %v116_v2, 0.0 }
  0xc0   :  { %506 = vmatmul.msk.f32.gmra.mxu1 %vm242_vm0, %v205_v3 }
  0xc1   :  { %v160_v4 = vpop.f32.mrf.mxu2 }
  0xc2   :  { %v161_v5 = vadd.f32 %v732_v52, %v160_v4 }
  0xc3   :  { %v118_v6 = vpop.f32.mrf.mxu0 }
  0xc4   :  { %v220_v7 = vmax.f32 %v161_v5, 0.0  ;;  %v119_v8 = vadd.f32 %v732_v52, %v118_v6 }
  0xc6   :  { %v206_v9 = vmax.f32 %v119_v8, 0.0  ;;  %521 = vmatmul.msk.f32.vlgmr.msrb.gmra.mxu3 %vm242_vm0, %v220_v7 }
  0xc8   :  { %507 = vmatmul.msk.f32.gmra.mxu1 %vm242_vm0, %v206_v9 }
  0xc9   :  { %v163_v10 = vpop.f32.mrf.mxu2 }
  0xca   :  { %v164_v11 = vadd.f32 %v732_v52, %v163_v10 }
  0xcb   :  { %v121_v12 = vpop.f32.mrf.mxu0 }
  0xcc   :  { %v221_v13 = vmax.f32 %v164_v11, 0.0  ;;  %v122_v14 = vadd.f32 %v732_v52, %v121_v12  ;;  %v152_v11 = vadd.f32 %v732_v52, %v736_v56  ;;  %v199_v56 = vpop.f32.mrf.mxu3 }
  0xce   :  { %v207_v15 = vmax.f32 %v122_v14, 0.0  ;;  %522 = vmatmul.msk.f32.gmra.mxu3 %vm242_vm0, %v221_v13  ;;  %v217_v14 = vmax.f32 %v152_v11, 0.0 }
  0xd0   :  { %508 = vmatmul.msk.f32.gmra.mxu1 %vm242_vm0, %v207_v15 }
  0xd1   :  { %v166_v16 = vpop.f32.mrf.mxu2 }
  0xd2   :  { %v167_v17 = vadd.f32 %v732_v52, %v166_v16  ;;  %v155_v16 = vadd.f32 %v732_v52, %v740_v60  ;;  %v158_v60 = vadd.f32 %v732_v52, %v744_v0 }
  0xd3   :  { %v124_v18 = vpop.f32.mrf.mxu0 }
  0xd4   :  { %v222_v19 = vmax.f32 %v167_v17, 0.0  ;;  %v125_v20 = vadd.f32 %v732_v52, %v124_v18  ;;  %v803_v18 = vld [vmem:[%s854_s4] ss:$0 sm:$0xff]  ;;  %s632_s4 = smov [#allocation5]  }
  0xd5   :  { %s488_s16 = sshll.u32 %s632_s4, 4  ;;  %s489_s16 = int_to_ptr.vmem [resolvable:$true] %s488_s16 }
  0xd6   :  { %v208_v21 = vmax.f32 %v125_v20, 0.0  ;;  %523 = vmatmul.msk.f32.gmra.mxu3 %vm242_vm0, %v222_v19 }
  0xd8   :  { %509 = vmatmul.msk.f32.gmra.mxu1 %vm242_vm0, %v208_v21  ;;  %v218_v21 = vmax.f32 %v155_v16, 0.0 }
  0xd9   :  { %v169_v22 = vpop.f32.mrf.mxu2 }
  0xda   :  { %v170_v23 = vadd.f32 %v732_v52, %v169_v22 }
  0xdb   :  { %v127_v24 = vpop.f32.mrf.mxu0 }
  0xdc   :  { %v223_v25 = vmax.f32 %v170_v23, 0.0  ;;  %v128_v26 = vadd.f32 %v732_v52, %v127_v24  ;;  %v200_v23 = vadd.f32 %v732_v52, %v199_v56 }
  0xde   :  { %v209_v27 = vmax.f32 %v128_v26, 0.0  ;;  %524 = vmatmul.msk.f32.gmra.mxu3 %vm242_vm0, %v223_v25  ;;  %v233_v24 = vmax.f32 %v200_v23, 0.0  ;;  %v219_v26 = vmax.f32 %v158_v60, 0.0 }
  0xe0   :  { %510 = vmatmul.msk.f32.gmra.mxu1 %vm242_vm0, %v209_v27 }
  0xe1   :  { %v172_v28 = vpop.f32.mrf.mxu2 }
  0xe2   :  { %v173_v29 = vadd.f32 %v732_v52, %v172_v28 }
  0xe3   :  { %v130_v30 = vpop.f32.mrf.mxu0 }
  0xe4   :  { %v224_v31 = vmax.f32 %v173_v29, 0.0  ;;  %v131_v32 = vadd.f32 %v732_v52, %v130_v30 }
  0xe6   :  { %v210_v33 = vmax.f32 %v131_v32, 0.0  ;;  %525 = vmatmul.msk.f32.gmra.mxu3 %vm242_vm0, %v224_v31 }
  0xe8   :  { %511 = vmatmul.msk.f32.gmra.mxu1 %vm242_vm0, %v210_v33 }
  0xe9   :  { %v175_v34 = vpop.f32.mrf.mxu2 }
  0xea   :  { %v176_v35 = vadd.f32 %v732_v52, %v175_v34 }
  0xeb   :  { %v133_v36 = vpop.f32.mrf.mxu0 }
  0xec   :  { %v225_v37 = vmax.f32 %v176_v35, 0.0  ;;  %v134_v38 = vadd.f32 %v732_v52, %v133_v36 }
  0xee   :  { %v211_v39 = vmax.f32 %v134_v38, 0.0  ;;  %526 = vmatmul.msk.f32.gmra.mxu3 %vm242_vm0, %v225_v37 }
  0xf0   :  { %512 = vmatmul.msk.f32.gmra.mxu1 %vm242_vm0, %v211_v39 }
  0xf1   :  { %v178_v40 = vpop.f32.mrf.mxu2 }
  0xf2   :  { %v179_v41 = vadd.f32 %v732_v52, %v178_v40 }
  0xf3   :  { %v136_v42 = vpop.f32.mrf.mxu0 }
  0xf4   :  { %v226_v43 = vmax.f32 %v179_v41, 0.0  ;;  %v137_v44 = vadd.f32 %v732_v52, %v136_v42 }
  0xf6   :  { %v212_v45 = vmax.f32 %v137_v44, 0.0  ;;  %527 = vmatmul.msk.f32.gmra.mxu3 %vm242_vm0, %v226_v43 }
  0xf8   :  { %513 = vmatmul.msk.f32.gmra.mxu1 %vm242_vm0, %v212_v45 }
  0xf9   :  { %v181_v46 = vpop.f32.mrf.mxu2 }
  0xfa   :  { %v182_v47 = vadd.f32 %v732_v52, %v181_v46 }
  0xfb   :  { %v139_v48 = vpop.f32.mrf.mxu0 }
  0xfc   :  { %v227_v49 = vmax.f32 %v182_v47, 0.0  ;;  %v140_v50 = vadd.f32 %v732_v52, %v139_v48 }
  0xfe   :  { %v213_v51 = vmax.f32 %v140_v50, 0.0  ;;  %528 = vmatmul.msk.f32.gmra.mxu3 %vm242_vm0, %v227_v49 }
 0x100   :  { %514 = vmatmul.msk.f32.gmra.mxu1 %vm242_vm0, %v213_v51 }
 0x101   :  { %v184_v53 = vpop.f32.mrf.mxu2 }
 0x102   :  { %v185_v54 = vadd.f32 %v732_v52, %v184_v53 }
 0x103   :  { %v142_v55 = vpop.f32.mrf.mxu0 }
 0x104   :  { %v228_v57 = vmax.f32 %v185_v54, 0.0  ;;  %v143_v58 = vadd.f32 %v732_v52, %v142_v55 }
 0x106   :  { %v214_v59 = vmax.f32 %v143_v58, 0.0  ;;  %529 = vmatmul.msk.f32.gmra.mxu3 %vm242_vm0, %v228_v57 }
 0x108   :  { %515 = vmatmul.msk.f32.gmra.mxu1 %vm242_vm0, %v214_v59 }
 0x109   :  { %v187_v61 = vpop.f32.mrf.mxu2 }
 0x10a   :  { %v188_v62 = vadd.f32 %v732_v52, %v187_v61 }
 0x10b   :  { %v145_v63 = vpop.f32.mrf.mxu0 }
 0x10c   :  { %v229_v1 = vmax.f32 %v188_v62, 0.0  ;;  %v146_v2 = vadd.f32 %v732_v52, %v145_v63 }
 0x10e   :  { %v215_v3 = vmax.f32 %v146_v2, 0.0  ;;  %530 = vmatmul.msk.f32.gmra.mxu3 %vm242_vm0, %v229_v1 }
 0x110   :  { %516 = vmatmul.msk.f32.gmra.mxu1 %vm242_vm0, %v215_v3 }
 0x111   :  { %v190_v4 = vpop.f32.mrf.mxu2 }
 0x112   :  { %v191_v5 = vadd.f32 %v732_v52, %v190_v4 }
 0x113   :  { %v148_v6 = vpop.f32.mrf.mxu0 }
 0x114   :  { %v230_v7 = vmax.f32 %v191_v5, 0.0  ;;  %v149_v8 = vadd.f32 %v732_v52, %v148_v6 }
 0x116   :  { %v216_v9 = vmax.f32 %v149_v8, 0.0  ;;  %531 = vmatmul.msk.f32.gmra.mxu3 %vm242_vm0, %v230_v7 }
 0x118   :  { %517 = vmatmul.msk.f32.gmra.mxu1 %vm242_vm0, %v216_v9 }
 0x119   :  { %v193_v10 = vpop.f32.mrf.mxu2 }
 0x11a   :  { %v194_v12 = vadd.f32 %v732_v52, %v193_v10 }
 0x11c   :  { %v231_v13 = vmax.f32 %v194_v12, 0.0 }
 0x11e   :  { %532 = vmatmul.msk.f32.gmra.mxu3 %vm242_vm0, %v231_v13 }
 0x120   :  { %518 = vmatmul.msk.f32.gmra.mxu1 %vm242_vm0, %v217_v14 }
 0x121   :  { %v196_v15 = vpop.f32.mrf.mxu2 }
 0x122   :  { %v197_v17 = vadd.f32 %v732_v52, %v196_v15 }
 0x124   :  { %v232_v19 = vmax.f32 %v197_v17, 0.0 }
 0x125   :  { %v356_v20 = vpop.f32.mrf.mxu1 }
 0x126   :  { %v357_v22 = vadd.f32 %v803_v18, %v356_v20  ;;  %533 = vmatmul.msk.f32.gmra.mxu3 %vm242_vm0, %v232_v19 }
 0x128   :  { %452 = vst [vmem:[#allocation5] sm:$0xff] %v357_v22  ;;  %519 = vmatmul.msk.f32.gmra.mxu1 %vm242_vm0, %v218_v21 }
 0x12d   :  { %v359_v25 = vpop.f32.mrf.mxu1 }
 0x12e   :  { %v360_v27 = vadd.f32 %v803_v18, %v359_v25  ;;  %534 = vmatmul.msk.f32.gmra.mxu3 %vm242_vm0, %v233_v24 }
 0x130   :  { %453 = vst [vmem:[#allocation5 + $0x8] sm:$0xff] %v360_v27  ;;  %520 = vmatmul.msk.f32.gmra.mxu1 %vm242_vm0, %v219_v26 }
 0x135   :  { %v362_v28 = vpop.f32.mrf.mxu1 }
 0x136   :  { %v363_v29 = vadd.f32 %v803_v18, %v362_v28 }
 0x138   :  { %454 = vst [vmem:[#allocation5 + $0x10] sm:$0xff] %v363_v29 }
 0x13d   :  { %v365_v30 = vpop.f32.mrf.mxu1 }
 0x13e   :  { %v366_v31 = vadd.f32 %v803_v18, %v365_v30 }
 0x140   :  { %455 = vst [vmem:[#allocation5 + $0x18] sm:$0xff] %v366_v31 }
 0x145   :  { %v368_v32 = vpop.f32.mrf.mxu1 }
 0x146   :  { %v369_v52 = vadd.f32 %v803_v18, %v368_v32 }
 0x148   :  { %456 = vst [vmem:[#allocation5 + $0x20] sm:$0xff] %v369_v52 }
 0x149   :  { %v410_v0 = vpop.f32.mrf.mxu3 }
 0x14a   :  { %v411_v33 = vadd.f32 %v803_v18, %v410_v0 }
 0x14c   :  { %470 = vst [vmem:[#allocation5 + $0x90] sm:$0xff] %v411_v33 }
 0x14d   :  { %v371_v34 = vpop.f32.mrf.mxu1 }
 0x14e   :  { %v372_v35 = vadd.f32 %v803_v18, %v371_v34 }
 0x150   :  { %457 = vst [vmem:[#allocation5 + $0x28] sm:$0xff] %v372_v35 }
 0x151   :  { %v413_v36 = vpop.f32.mrf.mxu3 }
 0x152   :  { %v414_v37 = vadd.f32 %v803_v18, %v413_v36 }
 0x154   :  { %471 = vst [vmem:[#allocation5 + $0x98] sm:$0xff] %v414_v37 }
 0x155   :  { %v374_v38 = vpop.f32.mrf.mxu1 }
 0x156   :  { %v375_v39 = vadd.f32 %v803_v18, %v374_v38 }
 0x158   :  { %458 = vst [vmem:[#allocation5 + $0x30] sm:$0xff] %v375_v39 }
 0x159   :  { %v416_v40 = vpop.f32.mrf.mxu3 }
 0x15a   :  { %v417_v41 = vadd.f32 %v803_v18, %v416_v40 }
 0x15c   :  { %472 = vst [vmem:[#allocation5 + $0xa0] sm:$0xff] %v417_v41 }
 0x15d   :  { %v377_v42 = vpop.f32.mrf.mxu1 }
 0x15e   :  { %v378_v43 = vadd.f32 %v803_v18, %v377_v42 }
 0x160   :  { %459 = vst [vmem:[#allocation5 + $0x38] sm:$0xff] %v378_v43 }
 0x161   :  { %v419_v44 = vpop.f32.mrf.mxu3 }
 0x162   :  { %v420_v45 = vadd.f32 %v803_v18, %v419_v44 }
 0x164   :  { %473 = vst [vmem:[#allocation5 + $0xa8] sm:$0xff] %v420_v45 }
 0x165   :  { %v380_v46 = vpop.f32.mrf.mxu1 }
 0x166   :  { %v381_v47 = vadd.f32 %v803_v18, %v380_v46 }
 0x168   :  { %460 = vst [vmem:[#allocation5 + $0x40] sm:$0xff] %v381_v47 }
 0x169   :  { %v422_v48 = vpop.f32.mrf.mxu3 }
 0x16a   :  { %v423_v49 = vadd.f32 %v803_v18, %v422_v48 }
 0x16c   :  { %474 = vst [vmem:[#allocation5 + $0xb0] sm:$0xff] %v423_v49 }
 0x16d   :  { %v383_v50 = vpop.f32.mrf.mxu1 }
 0x16e   :  { %v384_v51 = vadd.f32 %v803_v18, %v383_v50 }
 0x170   :  { %461 = vst [vmem:[#allocation5 + $0x48] sm:$0xff] %v384_v51 }
 0x171   :  { %v425_v53 = vpop.f32.mrf.mxu3 }
 0x172   :  { %v426_v54 = vadd.f32 %v803_v18, %v425_v53 }
 0x174   :  { %475 = vst [vmem:[#allocation5 + $0xb8] sm:$0xff] %v426_v54 }
 0x175   :  { %v386_v55 = vpop.f32.mrf.mxu1 }
 0x176   :  { %v387_v57 = vadd.f32 %v803_v18, %v386_v55 }
 0x178   :  { %462 = vst [vmem:[#allocation5 + $0x50] sm:$0xff] %v387_v57 }
 0x179   :  { %v428_v58 = vpop.f32.mrf.mxu3 }
 0x17a   :  { %v429_v59 = vadd.f32 %v803_v18, %v428_v58 }
 0x17c   :  { %476 = vst [vmem:[#allocation5 + $0xc0] sm:$0xff] %v429_v59 }
 0x17d   :  { %v389_v61 = vpop.f32.mrf.mxu1 }
 0x17e   :  { %v390_v62 = vadd.f32 %v803_v18, %v389_v61 }
 0x180   :  { %463 = vst [vmem:[#allocation5 + $0x58] sm:$0xff] %v390_v62 }
 0x181   :  { %v431_v63 = vpop.f32.mrf.mxu3 }
 0x182   :  { %v432_v1 = vadd.f32 %v803_v18, %v431_v63 }
 0x184   :  { %477 = vst [vmem:[#allocation5 + $0xc8] sm:$0xff] %v432_v1 }
 0x185   :  { %v392_v2 = vpop.f32.mrf.mxu1 }
 0x186   :  { %v393_v3 = vadd.f32 %v803_v18, %v392_v2 }
 0x188   :  { %464 = vst [vmem:[#allocation5 + $0x60] sm:$0xff] %v393_v3 }
 0x189   :  { %v434_v4 = vpop.f32.mrf.mxu3 }
 0x18a   :  { %v435_v5 = vadd.f32 %v803_v18, %v434_v4 }
 0x18c   :  { %478 = vst [vmem:[#allocation5 + $0xd0] sm:$0xff] %v435_v5 }
 0x18d   :  { %v395_v6 = vpop.f32.mrf.mxu1 }
 0x18e   :  { %v396_v7 = vadd.f32 %v803_v18, %v395_v6 }
 0x190   :  { %465 = vst [vmem:[#allocation5 + $0x68] sm:$0xff] %v396_v7 }
 0x191   :  { %v437_v8 = vpop.f32.mrf.mxu3 }
 0x192   :  { %v438_v9 = vadd.f32 %v803_v18, %v437_v8 }
 0x194   :  { %479 = vst [vmem:[#allocation5 + $0xd8] sm:$0xff] %v438_v9 }
 0x195   :  { %v398_v10 = vpop.f32.mrf.mxu1 }
 0x196   :  { %v399_v11 = vadd.f32 %v803_v18, %v398_v10 }
 0x198   :  { %466 = vst [vmem:[#allocation5 + $0x70] sm:$0xff] %v399_v11 }
 0x199   :  { %v440_v12 = vpop.f32.mrf.mxu3 }
 0x19a   :  { %v441_v13 = vadd.f32 %v803_v18, %v440_v12 }
 0x19c   :  { %480 = vst [vmem:[#allocation5 + $0xe0] sm:$0xff] %v441_v13 }
 0x19d   :  { %v401_v14 = vpop.f32.mrf.mxu1 }
 0x19e   :  { %v402_v15 = vadd.f32 %v803_v18, %v401_v14 }
 0x1a0   :  { %467 = vst [vmem:[#allocation5 + $0x78] sm:$0xff] %v402_v15 }
 0x1a1   :  { %v443_v16 = vpop.f32.mrf.mxu3 }
 0x1a2   :  { %v444_v17 = vadd.f32 %v803_v18, %v443_v16 }
 0x1a4   :  { %481 = vst [vmem:[#allocation5 + $0xe8] sm:$0xff] %v444_v17 }
 0x1a5   :  { %v404_v56 = vpop.f32.mrf.mxu1 }
 0x1a6   :  { %v405_v19 = vadd.f32 %v803_v18, %v404_v56 }
 0x1a8   :  { %468 = vst [vmem:[#allocation5 + $0x80] sm:$0xff] %v405_v19 }
 0x1a9   :  { %v446_v20 = vpop.f32.mrf.mxu3 }
 0x1aa   :  { %v447_v21 = vadd.f32 %v803_v18, %v446_v20 }
 0x1ac   :  { %482 = vst [vmem:[#allocation5 + $0xf0] sm:$0xff] %v447_v21 }
 0x1ad   :  { %v407_v22 = vpop.f32.mrf.mxu1 }
 0x1ae   :  { %v408_v23 = vadd.f32 %v803_v18, %v407_v22 }
 0x1b0   :  { %469 = vst [vmem:[#allocation5 + $0x88] sm:$0xff] %v408_v23 }
 0x1b1   :  { %v449_v60 = vpop.f32.mrf.mxu3 }
 0x1b2   :  { %v450_v24 = vadd.f32 %v803_v18, %v449_v60 }
 0x1b4   :  { %483 = vst [vmem:[#allocation5 + $0xf8] sm:$0xff] %v450_v24 }
 0x1b5   :  { %496 = dma.vmem_to_hbm [thread:$0]  %s489_s16, 4096, %s491_s19, [#allocation4], %s630_s23, %s630_s23, %s631_s24  }
 0x1b6   :  { %627 = dma.done.wait [#allocation4], 4096  }
 0x1b7   :  { %628 = vsyncadd [#allocation4], 4294963200 }
 0x1b8   :  { %501 = vsyncpa [#allocation3], 1 }
 0x1b9   :  { %502 = vsyncpa [#allocation4], 1 }

</bundles_post_ra>
